<compile_context>
chip_gen: v7x
topology: tpu7x:2x2x1
jax: 0.10.0
libtpu: 0.0.40
codegen_flags: <defaults>
</compile_context>

<pallas_src>
import functools

import jax
import jax.numpy as jnp
from jax.experimental import pallas as pl
from jax.experimental.pallas import tpu as pltpu

HIDDEN_PAD = 128        # lane-dense hidden width (logical 64 zero-padded)
W3_COL_PAD = 128        # lane-dense fc3 weight columns for the MXU dot
MAX_BATCH_BLOCK = 2048  # rows per grid step (step-overhead amortization)
MIN_SPLIT_BATCH = 256   # above this, force >=2 blocks so both v7x TCs get work


def _cdiv(a: int, b: int) -> int:
    return -(-a // b)


def _round_up(n: int, m: int) -> int:
    return _cdiv(n, m) * m


def qnetwork_kernel(x_ref, w1_ref, b1_ref, w2_ref, b2_ref, w3_ref, b3_ref,
                    out_ref):
    """One batch block: fc1+ReLU -> fc2+ReLU -> fc3; lane-dense matmuls,
    narrow (bb, action_size) store."""
    # Layer 1: x @ W1 + b1, ReLU   ((bb,S) @ (S,128) -> (bb,128))
    h1 = jnp.dot(x_ref[...], w1_ref[...], preferred_element_type=jnp.float32)
    h1 = jnp.maximum(h1 + b1_ref[...], 0.0)

    # Layer 2: h1 @ W2 + b2, ReLU  ((bb,128) @ (128,128) -> (bb,128))
    h2 = jnp.dot(h1, w2_ref[...], preferred_element_type=jnp.float32)
    h2 = jnp.maximum(h2 + b2_ref[...], 0.0)

    # Layer 3: h2 @ W3 (lane-dense 128-wide dot), then keep only the logical
    # action_size columns for the bias add + store. Padded W3 columns are zero.
    out = jnp.dot(h2, w3_ref[...], preferred_element_type=jnp.float32)
    a = out_ref.shape[-1]
    out_ref[...] = (out[:, :a] + b3_ref[...]).astype(out_ref.dtype)


def pad_params_for_kernel(params):
    """Zero-pad logical (in,out)-layout params to lane-dense 128-wide tiles.

    b3 stays at its logical (1, action_size) shape since the output store is
    narrow; w3 columns are padded so the MXU dot stays 128-lane dense."""
    w1, b1 = params["w1"], params["b1"]
    w2, b2 = params["w2"], params["b2"]
    w3, b3 = params["w3"], params["b3"]
    h1_log, h2_log = w1.shape[1], w2.shape[1]
    a_log = w3.shape[1]

    w1p = jnp.pad(w1, ((0, 0), (0, HIDDEN_PAD - h1_log)))
    b1p = jnp.pad(b1, ((0, 0), (0, HIDDEN_PAD - h1_log)))
    w2p = jnp.pad(w2, ((0, HIDDEN_PAD - h1_log), (0, HIDDEN_PAD - h2_log)))
    b2p = jnp.pad(b2, ((0, 0), (0, HIDDEN_PAD - h2_log)))
    w3p = jnp.pad(w3, ((0, HIDDEN_PAD - h2_log), (0, W3_COL_PAD - a_log)))
    b3p = b3
    return {"w1": w1p, "b1": b1p, "w2": w2p, "b2": b2p, "w3": w3p, "b3": b3p}


def _choose_batch_block(B: int):
    """Pick (bb, b_pad): >=2 blocks above MIN_SPLIT_BATCH (v7x megacore),
    <= MAX_BATCH_BLOCK rows per block, minimal padding (bb multiple of 8)."""
    n_blocks = max(_cdiv(B, MAX_BATCH_BLOCK), 2 if B > MIN_SPLIT_BATCH else 1)
    bb = _round_up(_cdiv(B, n_blocks), 8)
    b_pad = _round_up(B, bb)
    return bb, b_pad


@functools.partial(jax.jit, static_argnames=("action_size",))
def qnetwork_forward(x, padded_params, *, action_size):
    """x: (B, state_size) float32. padded_params: output of pad_params_for_kernel."""
    w1, b1 = padded_params["w1"], padded_params["b1"]
    w2, b2 = padded_params["w2"], padded_params["b2"]
    w3, b3 = padded_params["w3"], padded_params["b3"]

    B, S = x.shape
    bb, b_pad = _choose_batch_block(B)
    if b_pad != B:
        x = jnp.pad(x, ((0, b_pad - B), (0, 0)))
    grid = (b_pad // bb,)

    out = pl.pallas_call(
        qnetwork_kernel,
        out_shape=jax.ShapeDtypeStruct((b_pad, action_size), jnp.float32),
        grid=grid,
        in_specs=[
            # activation stream: one batch block per grid step
            pl.BlockSpec((bb, S), lambda i: (i, 0)),
            # weights / biases: constant block index -> VMEM-resident, no re-DMA
            pl.BlockSpec(w1.shape, lambda i: (0, 0)),
            pl.BlockSpec(b1.shape, lambda i: (0, 0)),
            pl.BlockSpec(w2.shape, lambda i: (0, 0)),
            pl.BlockSpec(b2.shape, lambda i: (0, 0)),
            pl.BlockSpec(w3.shape, lambda i: (0, 0)),
            pl.BlockSpec(b3.shape, lambda i: (0, 0)),
        ],
        # Output written at logical width: no full-width slab, no wrapper slice
        # over the lanes. Last dim equals the full array dim, so this is legal.
        out_specs=pl.BlockSpec((bb, action_size), lambda i: (i, 0)),
        compiler_params=pltpu.CompilerParams(
            dimension_semantics=("parallel",)),   # megacore sharding on v7x
    )(x, w1, b1, w2, b2, w3, b3)

    # Only drop batch padding (cheap, action_size columns); lanes already exact.
    return out if b_pad == B else out[:B]


def init_params(key, state_size, action_size, fc1_unit=64, fc2_unit=64):
    """Deterministic init mimicking PyTorch nn.Linear default (uniform +-1/sqrt(fan_in)).

    Weights are stored transposed vs. PyTorch: (in_features, out_features)."""
    def linear(k, fan_in, fan_out):
        kw, kb = jax.random.split(k)
        bound = 1.0 / jnp.sqrt(fan_in)
        w = jax.random.uniform(kw, (fan_in, fan_out), jnp.float32, -bound, bound)
        b = jax.random.uniform(kb, (1, fan_out), jnp.float32, -bound, bound)
        return w, b

    k1, k2, k3 = jax.random.split(key, 3)
    w1, b1 = linear(k1, state_size, fc1_unit)
    w2, b2 = linear(k2, fc1_unit, fc2_unit)
    w3, b3 = linear(k3, fc2_unit, action_size)
    return {"w1": w1, "b1": b1, "w2": w2, "b2": b2, "w3": w3, "b3": b3}


def reference_forward(x, p):
    h1 = jnp.maximum(x @ p["w1"] + p["b1"], 0.0)
    h2 = jnp.maximum(h1 @ p["w2"] + p["b2"], 0.0)
    return h2 @ p["w3"] + p["b3"]


if __name__ == "__main__":
    # Connect4: board 6x7 -> state_size=42, action_size=7 (columns).
    STATE_SIZE, ACTION_SIZE, BATCH = 42, 7, 2

    key = jax.random.PRNGKey(0)
    kp, kx = jax.random.split(key)
    params = init_params(kp, STATE_SIZE, ACTION_SIZE)
    padded = pad_params_for_kernel(params)
    x = jax.random.normal(kx, (BATCH, STATE_SIZE), jnp.float32)

    out = qnetwork_forward(x, padded, action_size=ACTION_SIZE)
    out = jax.block_until_ready(out)

    ref = reference_forward(x, params)
    assert out.shape == (BATCH, ACTION_SIZE)
    assert jnp.allclose(out, ref, atol=1e-5, rtol=1e-5)

    # Also exercise a realistic DQN batch (multi-block grid, padded-batch path).
    big_x = jax.random.normal(jax.random.PRNGKey(1), (1000, STATE_SIZE), jnp.float32)
    big_out = jax.block_until_ready(
        qnetwork_forward(big_x, padded, action_size=ACTION_SIZE))
    assert big_out.shape == (1000, ACTION_SIZE)
    assert jnp.allclose(big_out, reference_forward(big_x, params),
                        atol=1e-4, rtol=1e-4)

    print("KERNEL_OK")
</pallas_src>

<mosaic_0001>
module attributes {stable_mosaic.version = 11 : i64} {
  func.func @qnetwork_kernel(%arg0: i32, %arg1: memref<8x42xf32, #tpu.memory_space<vmem>>, %arg2: memref<42x128xf32, #tpu.memory_space<vmem>>, %arg3: memref<1x128xf32, #tpu.memory_space<vmem>>, %arg4: memref<128x128xf32, #tpu.memory_space<vmem>>, %arg5: memref<1x128xf32, #tpu.memory_space<vmem>>, %arg6: memref<128x128xf32, #tpu.memory_space<vmem>>, %arg7: memref<1x7xf32, #tpu.memory_space<vmem>>, %arg8: memref<8x7xf32, #tpu.memory_space<vmem>>) attributes {dimension_semantics = [#tpu.dimension_semantics<parallel>], iteration_bounds = array<i64: 1>, scalar_prefetch = 0 : i64, scratch_operands = 0 : i64, tpu.core_type = #tpu.core_type<tc>, window_params = [{transform_indices = @transform_0, window_bounds = array<i64: 8, 42>}, {pipeline_mode = #tpu.pipeline_mode<synchronous>, transform_indices = @transform_1, window_bounds = array<i64: 42, 128>}, {pipeline_mode = #tpu.pipeline_mode<synchronous>, transform_indices = @transform_2, window_bounds = array<i64: 1, 128>}, {pipeline_mode = #tpu.pipeline_mode<synchronous>, transform_indices = @transform_3, window_bounds = array<i64: 128, 128>}, {pipeline_mode = #tpu.pipeline_mode<synchronous>, transform_indices = @transform_4, window_bounds = array<i64: 1, 128>}, {pipeline_mode = #tpu.pipeline_mode<synchronous>, transform_indices = @transform_5, window_bounds = array<i64: 128, 128>}, {pipeline_mode = #tpu.pipeline_mode<synchronous>, transform_indices = @transform_6, window_bounds = array<i64: 1, 7>}, {transform_indices = @transform_7, window_bounds = array<i64: 8, 7>}]} {
    %c0 = arith.constant 0 : index
    %c0_0 = arith.constant 0 : index
    %0 = vector.load %arg1[%c0, %c0_0] : memref<8x42xf32, #tpu.memory_space<vmem>>, vector<8x42xf32>
    %c0_1 = arith.constant 0 : index
    %c0_2 = arith.constant 0 : index
    %1 = vector.load %arg2[%c0_1, %c0_2] : memref<42x128xf32, #tpu.memory_space<vmem>>, vector<42x128xf32>
    %cst = arith.constant dense<0.000000e+00> : vector<8x128xf32>
    %2 = tpu.matmul %0, %1, %cst {dimension_numbers = #tpu.dot_dimension_numbers<[1], [0], [0], [1], [0, 0, 1, 1], [], []>} : vector<8x42xf32>, vector<42x128xf32>, vector<8x128xf32> -> vector<8x128xf32>
    %c0_3 = arith.constant 0 : index
    %c0_4 = arith.constant 0 : index
    %3 = vector.load %arg3[%c0_3, %c0_4] : memref<1x128xf32, #tpu.memory_space<vmem>>, vector<1x128xf32>
    %4 = vector.broadcast %3 : vector<1x128xf32> to vector<8x128xf32>
    %5 = arith.addf %2, %4 : vector<8x128xf32>
    %cst_5 = arith.constant 0.000000e+00 : f32
    %6 = vector.broadcast %cst_5 : f32 to vector<8x128xf32>
    %7 = arith.maximumf %5, %6 : vector<8x128xf32>
    %c0_6 = arith.constant 0 : index
    %c0_7 = arith.constant 0 : index
    %8 = vector.load %arg4[%c0_6, %c0_7] : memref<128x128xf32, #tpu.memory_space<vmem>>, vector<128x128xf32>
    %cst_8 = arith.constant dense<0.000000e+00> : vector<8x128xf32>
    %9 = tpu.matmul %7, %8, %cst_8 {dimension_numbers = #tpu.dot_dimension_numbers<[1], [0], [0], [1], [0, 0, 1, 1], [], []>} : vector<8x128xf32>, vector<128x128xf32>, vector<8x128xf32> -> vector<8x128xf32>
    %c0_9 = arith.constant 0 : index
    %c0_10 = arith.constant 0 : index
    %10 = vector.load %arg5[%c0_9, %c0_10] : memref<1x128xf32, #tpu.memory_space<vmem>>, vector<1x128xf32>
    %11 = vector.broadcast %10 : vector<1x128xf32> to vector<8x128xf32>
    %12 = arith.addf %9, %11 : vector<8x128xf32>
    %cst_11 = arith.constant 0.000000e+00 : f32
    %13 = vector.broadcast %cst_11 : f32 to vector<8x128xf32>
    %14 = arith.maximumf %12, %13 : vector<8x128xf32>
    %c0_12 = arith.constant 0 : index
    %c0_13 = arith.constant 0 : index
    %15 = vector.load %arg6[%c0_12, %c0_13] : memref<128x128xf32, #tpu.memory_space<vmem>>, vector<128x128xf32>
    %cst_14 = arith.constant dense<0.000000e+00> : vector<8x128xf32>
    %16 = tpu.matmul %14, %15, %cst_14 {dimension_numbers = #tpu.dot_dimension_numbers<[1], [0], [0], [1], [0, 0, 1, 1], [], []>} : vector<8x128xf32>, vector<128x128xf32>, vector<8x128xf32> -> vector<8x128xf32>
    %17 = vector.extract_strided_slice %16 {offsets = [0, 0], sizes = [8, 7], strides = [1, 1]} : vector<8x128xf32> to vector<8x7xf32>
    %c0_15 = arith.constant 0 : index
    %c0_16 = arith.constant 0 : index
    %18 = vector.load %arg7[%c0_15, %c0_16] : memref<1x7xf32, #tpu.memory_space<vmem>>, vector<1x7xf32>
    %19 = vector.broadcast %18 : vector<1x7xf32> to vector<8x7xf32>
    %20 = arith.addf %17, %19 : vector<8x7xf32>
    %c0_17 = arith.constant 0 : index
    %c0_18 = arith.constant 0 : index
    %21 = vector.load %arg8[%c0_17, %c0_18] : memref<8x7xf32, #tpu.memory_space<vmem>>, vector<8x7xf32>
    tpu.vector_store %arg8[%c0_17, %c0_18], %20 {strides = array<i32>} : memref<8x7xf32, #tpu.memory_space<vmem>>, vector<8x7xf32>,
    return
  }
  func.func @transform_0(%arg0: i32) -> (i32, i32) {
    %c0_i32 = arith.constant 0 : i32
    %c0_i32_0 = arith.constant 0 : i32
    return %arg0, %c0_i32 : i32, i32
  }
  func.func @transform_1(%arg0: i32) -> (i32, i32) {
    %c0_i32 = arith.constant 0 : i32
    %c0_i32_0 = arith.constant 0 : i32
    %c0_i32_1 = arith.constant 0 : i32
    return %c0_i32, %c0_i32_0 : i32, i32
  }
  func.func @transform_2(%arg0: i32) -> (i32, i32) {
    %c0_i32 = arith.constant 0 : i32
    %c0_i32_0 = arith.constant 0 : i32
    %c0_i32_1 = arith.constant 0 : i32
    return %c0_i32, %c0_i32_0 : i32, i32
  }
  func.func @transform_3(%arg0: i32) -> (i32, i32) {
    %c0_i32 = arith.constant 0 : i32
    %c0_i32_0 = arith.constant 0 : i32
    %c0_i32_1 = arith.constant 0 : i32
    return %c0_i32, %c0_i32_0 : i32, i32
  }
  func.func @transform_4(%arg0: i32) -> (i32, i32) {
    %c0_i32 = arith.constant 0 : i32
    %c0_i32_0 = arith.constant 0 : i32
    %c0_i32_1 = arith.constant 0 : i32
    return %c0_i32, %c0_i32_0 : i32, i32
  }
  func.func @transform_5(%arg0: i32) -> (i32, i32) {
    %c0_i32 = arith.constant 0 : i32
    %c0_i32_0 = arith.constant 0 : i32
    %c0_i32_1 = arith.constant 0 : i32
    return %c0_i32, %c0_i32_0 : i32, i32
  }
  func.func @transform_6(%arg0: i32) -> (i32, i32) {
    %c0_i32 = arith.constant 0 : i32
    %c0_i32_0 = arith.constant 0 : i32
    %c0_i32_1 = arith.constant 0 : i32
    return %c0_i32, %c0_i32_0 : i32, i32
  }
  func.func @transform_7(%arg0: i32) -> (i32, i32) {
    %c0_i32 = arith.constant 0 : i32
    %c0_i32_0 = arith.constant 0 : i32
    return %arg0, %c0_i32 : i32, i32
  }
}

</mosaic_0001>

<bundles_post_ra>
// kernel: qnetwork_forward.1
= control target key start
LH: loop header
LB: loop body
LE: loop exit
PB: predicated region body
PF: predicated region fallthrough
CT: control target
= control target key end

     0   :  { %12 = vsyncpa [#allocation3], 0  ;;  %s762_s0 = inlined_call_operand.vmem [shape: f32[8,42], index: 0, kind: input, shape index: {}]   ;;  %s763_s1 = inlined_call_operand.hbm [shape: f32[42,128], index: 1, kind: input, shape index: {}]   ;;  %s764_s2 = inlined_call_operand.vmem [shape: f32[1,128], index: 2, kind: input, shape index: {}]   ;;  %s765_s3 = inlined_call_operand.hbm [shape: f32[128,128], index: 3, kind: input, shape index: {}]   ;;  %s766_s4 = inlined_call_operand.vmem [shape: f32[1,128], index: 4, kind: input, shape index: {}]   ;;  %s767_s5 = inlined_call_operand.hbm [shape: f32[128,128], index: 5, kind: input, shape index: {}]   ;;  %s768_s6 = inlined_call_operand.vmem [shape: f32[1,7], index: 6, kind: input, shape index: {}]   ;;  %s769_s7 = inlined_call_operand.vmem [shape: f32[8,7], index: 7, kind: output, shape index: {}]  }
   0x1   :  { %13 = vsyncpa [#allocation5], 0  ;;  %s624_s24 = smov [#allocation4]   ;;  %s625_s26 = smov [#allocation2]  }
   0x2   :  { %s35_s25 = sshll.u32 %s624_s24, 4  ;;  %s21_s27 = sshll.u32 %s625_s26, 4  ;;  %s36_s25 = int_to_ptr.vmem [resolvable:$true] %s35_s25  ;;  %s673_s27 = int_to_ptr.vmem [resolvable:$true] %s21_s27 }
   0x3   :  { %s554_s30 = scalar_lea.hbm %s765_s3, 2048 }
   0x4   :  { %p555_p0 = scmp.ne.s32.totalorder %s765_s3, %s554_s30  ;;  %p558_p1 = scmp.lt.u32.totalorder %s554_s30, %s765_s3 }
   0x6   :  { %p560_p2 = pnand %p558_p1, %p555_p0 }
   0x8   :  { %563 = shalt.err (!%p560_p2)
}
   0x9   :  { %s564_s12 = scalar_lea.vmem %s36_s25, 2048  ;;  %p569_p4 = scmp.lt.s32.totalorder %s36_s25, %s36_s25 }
   0xa   :  { %p565_p3 = scmp.ne.s32.totalorder %s36_s25, %s564_s12  ;;  %p570_p5 = scmp.lt.s32.totalorder %s564_s12, %s564_s12 }
   0xc   :  { %p571_p6 = por %p570_p5, %p569_p4 }
   0xe   :  { %p572_p7 = pnand %p571_p6, %p565_p3 }
  0x10   :  { %575 = shalt.err (!%p572_p7)
}
  0x11   :  { %s626_s13 = smov 128   ;;  %s627_s14 = smov 8  }
  0x12   :  { %41 = dma.hbm_to_vmem [thread:$0]  %s765_s3, 2048, %s36_s25, [#allocation5], %s626_s13, %s626_s13, %s627_s14  }
  0x13   :  { %s576_s19 = scalar_lea.hbm %s763_s1, 768 }
  0x14   :  { %p577_p8 = scmp.ne.s32.totalorder %s763_s1, %s576_s19  ;;  %p580_p9 = scmp.lt.u32.totalorder %s576_s19, %s763_s1 }
  0x16   :  { %p582_p10 = pnand %p580_p9, %p577_p8 }
  0x18   :  { %585 = shalt.err (!%p582_p10)
}
  0x19   :  { %s586_s24 = scalar_lea.vmem %s673_s27, 768  ;;  %p591_p12 = scmp.lt.s32.totalorder %s673_s27, %s673_s27 }
  0x1a   :  { %p587_p11 = scmp.ne.s32.totalorder %s673_s27, %s586_s24  ;;  %p592_p13 = scmp.lt.s32.totalorder %s586_s24, %s586_s24 }
  0x1c   :  { %p593_p0 = por %p592_p13, %p591_p12 }
  0x1e   :  { %p594_p1 = pnand %p593_p0, %p587_p11 }
  0x20   :  { %597 = shalt.err (!%p594_p1)
}
  0x21   :  { %27 = dma.hbm_to_vmem [thread:$0]  %s763_s1, 768, %s673_s27, [#allocation3], %s626_s13, %s626_s13, %s627_s14  }
  0x22   :  { %s628_s26 = smov [#allocation6]   ;;  %s598_s8 = scalar_lea.hbm %s767_s5, 2048 }
  0x23   :  { %s49_s28 = sshll.u32 %s628_s26, 4  ;;  %p599_p2 = scmp.ne.s32.totalorder %s767_s5, %s598_s8  ;;  %s50_s28 = int_to_ptr.vmem [resolvable:$true] %s49_s28 }
  0x24   :  { %p602_p3 = scmp.lt.u32.totalorder %s598_s8, %s767_s5 }
  0x26   :  { %p604_p4 = pnand %p602_p3, %p599_p2 }
  0x28   :  { %607 = shalt.err (!%p604_p4)
}
  0x29   :  { %s608_s15 = scalar_lea.vmem %s50_s28, 2048  ;;  %p613_p6 = scmp.lt.s32.totalorder %s50_s28, %s50_s28 }
  0x2a   :  { %p609_p5 = scmp.ne.s32.totalorder %s50_s28, %s608_s15  ;;  %p614_p7 = scmp.lt.s32.totalorder %s608_s15, %s608_s15 }
  0x2c   :  { %p615_p8 = por %p614_p7, %p613_p6 }
  0x2e   :  { %p616_p9 = pnand %p615_p8, %p609_p5 }
  0x30   :  { %619 = shalt.err (!%p616_p9)
}
  0x31   :  { %55 = dma.hbm_to_vmem [thread:$0]  %s767_s5, 2048, %s50_s28, [#allocation5], %s626_s13, %s626_s13, %s627_s14  }
  0x32   :  { %620 = dma.done.wait [#allocation3], 768  }
  0x33   :  { %621 = vsyncadd [#allocation3], 4294966528 }
  0x34   :  { %622 = dma.done.wait [#allocation5], 4096  }
  0x35   :  { %623 = vsyncadd [#allocation5], 4294963200  ;;  %v629_v0 = vmov 0.0|0.0   ;;  %vm630_vm0 = vmmov 0   ;;  %v631_v1 = vmov 0.0   ;;  %v68_v2 = vld [vmem:[#allocation2] sm:$0xff] }
  0x36   :  { %487 = vmatprep.subr.bf16.mxu0 %v629_v0  ;;  %497 = vmatprep.subr.bf16.mxu1 %v629_v0  ;;  %v69_v3 = vld [vmem:[#allocation2 + $0x8] sm:$0xff]  ;;  %v70_v4 = vld [vmem:[#allocation2 + $0x10] sm:$0xff]  ;;  %v71_v6 = vld [vmem:[#allocation2 + $0x18] sm:$0xff]  ;;  %vm85_vm1 = vcmask 1041408   ;;  %vm632_vm2 = vmmov 1   ;;  %vm81_vm4 = vcmask 343040  }
  0x37   :  { %414 = vmatprep.mubr.msk.f32.mxu0 %vm630_vm0, %v631_v1  ;;  %449 = vmatprep.mubr.msk.f32.mxu1 %vm630_vm0, %v631_v1  ;;  %v488_v5 = vpack.c.bf16 %v69_v3, %v68_v2  ;;  %v160_v7 = vld [vmem:[#allocation4] sm:$0xff]  ;;  %v161_v8 = vld [vmem:[#allocation4 + $0x8] sm:$0xff]  ;;  %v491_v9 = vpack.c.bf16 %v71_v6, %v70_v4  ;;  %v162_v11 = vld [vmem:[#allocation4 + $0x10] sm:$0xff]  ;;  %vm348_vm5 = vcmask 56320  }
  0x38   :  { %v498_v10 = vpack.c.bf16 %v161_v8, %v160_v7  ;;  %v163_v12 = vld [vmem:[#allocation4 + $0x18] sm:$0xff]  ;;  %v72_v13 = vld [vmem:[#allocation2 + $0x20] sm:$0xff]  ;;  %v164_v16 = vld [vmem:[#allocation4 + $0x20] sm:$0xff] }
  0x39   :  { %489 = vmatpush3.bf16.msra.mxu0 %v488_v5  ;;  %v73_v14 = vld [vmem:[#allocation2 + $0x28] sm:$0x3]  ;;  %v501_v15 = vpack.c.bf16 %v163_v12, %v162_v11  ;;  %v165_v17 = vld [vmem:[#allocation4 + $0x28] sm:$0xff]  ;;  %vm495_vm3 = vmpackc.low %vm85_vm1, %vm632_vm2 }
  0x3a   :  { %490 = vmatprep.subr.bf16.mxu0 %v629_v0  ;;  %499 = vmatpush3.bf16.msra.mxu1 %v498_v10  ;;  %v494_v18 = vpack.c.bf16 %v73_v14, %v72_v13  ;;  %v504_v19 = vpack.c.bf16 %v165_v17, %v164_v16  ;;  %v166_v20 = vld [vmem:[#allocation4 + $0x30] sm:$0xff]  ;;  %v167_v21 = vld [vmem:[#allocation4 + $0x38] sm:$0xff]  ;;  %v168_v24 = vld [vmem:[#allocation4 + $0x40] sm:$0xff] }
  0x3b   :  { %500 = vmatprep.subr.bf16.mxu1 %v629_v0  ;;  %v67_v22 = vld [vmem:[%s762_s0] sm:$0xff]  ;;  %v507_v23 = vpack.c.bf16 %v167_v21, %v166_v20  ;;  %v169_v25 = vld [vmem:[#allocation4 + $0x48] sm:$0xff]  ;;  %v171_v28 = vld [vmem:[#allocation4 + $0x58] sm:$0xff] }
  0x3c   :  { %v510_v26 = vpack.c.bf16 %v169_v25, %v168_v24  ;;  %v170_v27 = vld [vmem:[#allocation4 + $0x50] sm:$0xff]  ;;  %v172_v30 = vld [vmem:[#allocation4 + $0x60] sm:$0xff]  ;;  %v173_v31 = vld [vmem:[#allocation4 + $0x68] sm:$0xff] }
  0x3d   :  { %492 = vmatpush3.bf16.msra.mxu0 %v491_v9  ;;  %v513_v29 = vpack.c.bf16 %v171_v28, %v170_v27  ;;  %v516_v32 = vpack.c.bf16 %v173_v31, %v172_v30  ;;  %v174_v33 = vld [vmem:[#allocation4 + $0x70] sm:$0xff]  ;;  %v175_v34 = vld [vmem:[#allocation4 + $0x78] sm:$0xff]  ;;  %v254_v36 = vld [vmem:[#allocation6] sm:$0xff] }
  0x3e   :  { %493 = vmatprep.subr.bf16.mxu0 %v629_v0  ;;  %502 = vmatpush3.bf16.msra.mxu1 %v501_v15  ;;  %v519_v35 = vpack.c.bf16 %v175_v34, %v174_v33  ;;  %v255_v37 = vld [vmem:[#allocation6 + $0x8] sm:$0xff]  ;;  %v256_v38 = vld [vmem:[#allocation6 + $0x10] sm:$0xff]  ;;  %v257_v40 = vld [vmem:[#allocation6 + $0x18] sm:$0xff] }
  0x3f   :  { %503 = vmatprep.subr.bf16.mxu1 %v629_v0  ;;  %v522_v39 = vpack.c.bf16 %v255_v37, %v254_v36  ;;  %v525_v41 = vpack.c.bf16 %v257_v40, %v256_v38  ;;  %v258_v42 = vld [vmem:[#allocation6 + $0x20] sm:$0xff]  ;;  %v259_v43 = vld [vmem:[#allocation6 + $0x28] sm:$0xff]  ;;  %v260_v45 = vld [vmem:[#allocation6 + $0x30] sm:$0xff] }
  0x40   :  { %v528_v44 = vpack.c.bf16 %v259_v43, %v258_v42  ;;  %v261_v46 = vld [vmem:[#allocation6 + $0x38] sm:$0xff]  ;;  %v262_v48 = vld [vmem:[#allocation6 + $0x40] sm:$0xff]  ;;  %v263_v49 = vld [vmem:[#allocation6 + $0x48] sm:$0xff] }
  0x41   :  { %496 = vmatpush3.bf16.msk.msra.mxu0 %vm495_vm3, %v494_v18  ;;  %v531_v47 = vpack.c.bf16 %v261_v46, %v260_v45  ;;  %v534_v50 = vpack.c.bf16 %v263_v49, %v262_v48  ;;  %v264_v51 = vld [vmem:[#allocation6 + $0x50] sm:$0xff]  ;;  %v265_v52 = vld [vmem:[#allocation6 + $0x58] sm:$0xff]  ;;  %v266_v54 = vld [vmem:[#allocation6 + $0x60] sm:$0xff] }
  0x42   :  { %521 = vmatprep.subr.bf16.mxu0 %v629_v0  ;;  %505 = vmatpush3.bf16.msra.mxu1 %v504_v19  ;;  %v537_v53 = vpack.c.bf16 %v265_v52, %v264_v51  ;;  %v267_v55 = vld [vmem:[#allocation6 + $0x68] sm:$0xff]  ;;  %v356_v57 = vld [vmem:[%s764_s2] ss:$0 sm:$0xff]  ;;  %v269_v63 = vld [vmem:[#allocation6 + $0x78] sm:$0xff] }
  0x43   :  { %506 = vmatprep.subr.bf16.mxu1 %v629_v0  ;;  %v540_v56 = vpack.c.bf16 %v267_v55, %v266_v54  ;;  %v268_v62 = vld [vmem:[#allocation6 + $0x70] sm:$0xff] }
  0x44   :  { %415 = vmatmul.mubr.msk.f32.vlgmr.msra.gmra.mrb[0].mxu0 %vm81_vm4, %v67_v22  ;;  %v359_v2 = vld [vmem:[%s766_s4] ss:$0 sm:$0xff] }
  0x45   :  { %484 = vmatprep.mubr.msk.f32.mxu0 %vm630_vm0, %v631_v1  ;;  %523 = vmatpush3.bf16.msra.mxu0 %v522_v39  ;;  %v543_v1 = vpack.c.bf16 %v269_v63, %v268_v62  ;;  %v360_v6 = vld [vmem:[%s768_s6] ss:$0 sm:$0xff] }
  0x46   :  { %508 = vmatpush3.bf16.msra.mxu1 %v507_v23  ;;  %524 = vmatprep.subr.bf16.mxu0 %v629_v0 }
  0x47   :  { %509 = vmatprep.subr.bf16.mxu1 %v629_v0 }
  0x49   :  { %526 = vmatpush3.bf16.msra.mxu0 %v525_v41 }
  0x4a   :  { %511 = vmatpush3.bf16.msra.mxu1 %v510_v26  ;;  %527 = vmatprep.subr.bf16.mxu0 %v629_v0 }
  0x4b   :  { %512 = vmatprep.subr.bf16.mxu1 %v629_v0 }
  0x4d   :  { %529 = vmatpush3.bf16.msra.mxu0 %v528_v44 }
  0x4e   :  { %514 = vmatpush3.bf16.msra.mxu1 %v513_v29  ;;  %530 = vmatprep.subr.bf16.mxu0 %v629_v0 }
  0x4f   :  { %515 = vmatprep.subr.bf16.mxu1 %v629_v0 }
  0x51   :  { %532 = vmatpush3.bf16.msra.mxu0 %v531_v47 }
  0x52   :  { %517 = vmatpush3.bf16.msra.mxu1 %v516_v32  ;;  %533 = vmatprep.subr.bf16.mxu0 %v629_v0 }
  0x53   :  { %518 = vmatprep.subr.bf16.mxu1 %v629_v0 }
  0x55   :  { %535 = vmatpush3.bf16.msra.mxu0 %v534_v50 }
  0x56   :  { %520 = vmatpush3.bf16.msra.mxu1 %v519_v35  ;;  %536 = vmatprep.subr.bf16.mxu0 %v629_v0 }
  0x59   :  { %538 = vmatpush3.bf16.msra.mxu0 %v537_v53 }
  0x5a   :  { %539 = vmatprep.subr.bf16.mxu0 %v629_v0 }
  0x5d   :  { %541 = vmatpush3.bf16.msra.mxu0 %v540_v56 }
  0x5e   :  { %542 = vmatprep.subr.bf16.mxu0 %v629_v0 }
  0x61   :  { %544 = vmatpush3.bf16.msra.mxu0 %v543_v1 }
 0x117   :  { %v155_v58 = vpop.f32.mrb[0].mxu0 }
 0x118   :  { %v156_v59 = vadd.f32 %v356_v57, %v155_v58  ;;  %v416_v60 = vpop.f32.mrb[1].mxu0 }
 0x11a   :  { %v159_v61 = vmax.f32 %v156_v59, 0.0 }
 0x11c   :  { %450 = vmatmul.mubr.f32.vlgmr.msra.gmra.mrb[0].mxu1 %v159_v61 }
 0x1ef   :  { %v249_v3 = vpop.f32.mrb[0].mxu1 }
 0x1f0   :  { %v250_v4 = vadd.f32 %v359_v2, %v249_v3  ;;  %v451_v0 = vpop.f32.mrb[1].mxu1 }
 0x1f2   :  { %v253_v5 = vmax.f32 %v250_v4, 0.0 }
 0x1f4   :  { %485 = vmatmul.mubr.f32.vlgmr.msra.gmra.mrb[2].mxu0 %v253_v5 }
 0x2c7   :  { %v336_v7 = vpop.f32.mrb[2].mxu0 }
 0x2c8   :  { %v347_v8 = vadd.f32 %v360_v6, %v336_v7  ;;  %v486_v9 = vpop.f32.mrb[3].mxu0 }
 0x2ca   :  { %349 = vst.msk [vmem:[%s769_s7] sm:$0xff] %vm348_vm5, %v347_v8 }
 0x2cb   :  { %354 = vsyncpa [#allocation3], 1 }
 0x2cc   :  { %355 = vsyncpa [#allocation5], 1 }

</bundles_post_ra>
